<compile_context>
chip_gen: v5e
topology: v5e:2x2
jax: 0.10.0
libtpu: 0.0.40
codegen_flags: <defaults>
</compile_context>

<pallas_src>
import jax
import jax.numpy as jnp
from jax.experimental import pallas as pl
from jax.experimental.pallas import tpu as pltpu


def _full2d(shape):
    """BlockSpec covering an entire 2-D array (block == full array)."""
    return pl.BlockSpec(shape, lambda i: (0, 0))


# ---------------------------------------------------------------------------
# Kernel 1: per-(N, C) AdaIN statistics, folded with alpha.
#   basic_fc: Linear(512,512) + LeakyReLU(0.2)
#   heads   : one merged Linear(512, 2C)  -> [mean | var], ReLU on var
#   outputs : scale = alpha*var + (1-alpha),  shift = alpha*mean
# ---------------------------------------------------------------------------
def _stats_kernel(alpha_ref, sc_ref, w1_ref, b1_ref, wh_ref, bh_ref,
                  scale_ref, shift_ref):
    alpha = alpha_ref[0]                                   # scalar from SMEM
    h = jnp.dot(sc_ref[...], w1_ref[...],
                preferred_element_type=jnp.float32) + b1_ref[...]
    h = jnp.where(h > 0, h, 0.2 * h)                       # LeakyReLU(0.2)

    mv = jnp.dot(h, wh_ref[...],
                 preferred_element_type=jnp.float32) + bh_ref[...]
    C = scale_ref.shape[1]
    mean = mv[:, :C]
    var = jnp.maximum(mv[:, C:], 0.0)                      # ReLU on fc_var

    scale_ref[...] = (alpha * var + (1.0 - alpha)).astype(scale_ref.dtype)
    shift_ref[...] = (alpha * mean).astype(shift_ref.dtype)


# ---------------------------------------------------------------------------
# Kernel 2: elementwise modulation (single FMA + LeakyReLU per element).
#   o = LeakyReLU(0.2)(scale * x + shift)
# ---------------------------------------------------------------------------
def _modulate_kernel(x_ref, scale_ref, shift_ref, o_ref):
    y = scale_ref[...] * x_ref[...] + shift_ref[...]
    o_ref[...] = jnp.where(y > 0, y, 0.2 * y)


def _choose_tiles(rows, spatial, elem_bytes, target_block_bytes=2 * 1024 * 1024):
    """Pick (row_tile, spatial_tile): lane dim a multiple of 128, sublane a
    multiple of 8, x-block capped at ~2 MiB so 2x double-buffered in/out tiles
    stay well inside scoped VMEM on v5e/v6e/v7x."""
    lane = 128
    spatial_tile = min(pl.cdiv(spatial, lane) * lane, 2048)
    max_rows = max(8, (target_block_bytes // (spatial_tile * elem_bytes)) // 8 * 8)
    row_tile = min(pl.cdiv(rows, 8) * 8, max_rows)
    return int(row_tile), int(spatial_tile)


def adain_forward(x, shared_code, alpha, params, *, row_tile=None, spatial_tile=None):
    """x: (N, C, D, H, W) f32, shared_code: (N, 512) f32, alpha: scalar f32."""
    N, C, D, H, W = x.shape
    w1, b1, wm, bm, wv, bv = params

    # Merge the two head matmuls into a single (512, 2C) matmul.
    wh = jnp.concatenate([wm, wv], axis=1)
    bh = jnp.concatenate([bm, bv], axis=1)
    alpha_arr = jnp.asarray(alpha, jnp.float32).reshape(1)

    # --- Pallas call 1: tiny statistics MLP (MXU) ---------------------------
    scale, shift = pl.pallas_call(
        _stats_kernel,
        grid=(1,),
        out_shape=(jax.ShapeDtypeStruct((N, C), jnp.float32),
                   jax.ShapeDtypeStruct((N, C), jnp.float32)),
        in_specs=[pl.BlockSpec(memory_space=pltpu.MemorySpace.SMEM),   # alpha
                  _full2d(shared_code.shape), _full2d(w1.shape), _full2d(b1.shape),
                  _full2d(wh.shape), _full2d(bh.shape)],
        out_specs=(_full2d((N, C)), _full2d((N, C))),
    )(alpha_arr, shared_code, w1, b1, wh, bh)

    # --- Pallas call 2: HBM-bound elementwise modulation --------------------
    rows = N * C
    S = D * H * W
    x2 = x.reshape(rows, S)
    scale2 = scale.reshape(rows, 1)
    shift2 = shift.reshape(rows, 1)

    auto_rt, auto_st = _choose_tiles(rows, S, x.dtype.itemsize)
    rt = auto_rt if row_tile is None else int(row_tile)
    st = auto_st if spatial_tile is None else int(spatial_tile)

    grid = (pl.cdiv(rows, rt), pl.cdiv(S, st))

    out2 = pl.pallas_call(
        _modulate_kernel,
        grid=grid,
        out_shape=jax.ShapeDtypeStruct((rows, S), x.dtype),
        in_specs=[pl.BlockSpec((rt, st), lambda i, j: (i, j)),
                  pl.BlockSpec((rt, 1), lambda i, j: (i, 0)),
                  pl.BlockSpec((rt, 1), lambda i, j: (i, 0))],
        out_specs=pl.BlockSpec((rt, st), lambda i, j: (i, j)),
        compiler_params=pltpu.CompilerParams(
            dimension_semantics=("parallel", "parallel"),
            vmem_limit_bytes=32 * 1024 * 1024),
    )(x2, scale2, shift2)

    return out2.reshape(N, C, D, H, W)


if __name__ == "__main__":
    key = jax.random.PRNGKey(0)
    ks = jax.random.split(key, 8)

    # Small shapes consistent with the module: 5-D input, 512-dim shared code.
    N, C, D, H, W = 2, 8, 4, 8, 8

    x = jax.random.normal(ks[0], (N, C, D, H, W), jnp.float32)
    shared_code = jax.random.normal(ks[1], (N, 512), jnp.float32)
    alpha = jnp.float32(0.7)

    # Deterministic synthetic parameters (torch stores Linear weight as
    # (out, in); here we keep (in, out) so the kernel does x @ W + b).
    w1 = jax.random.normal(ks[2], (512, 512), jnp.float32) * 0.02
    b1 = jax.random.normal(ks[3], (1, 512), jnp.float32) * 0.02
    wm = jax.random.normal(ks[4], (512, C), jnp.float32) * 0.02
    bm = jax.random.normal(ks[5], (1, C), jnp.float32) * 0.02
    wv = jax.random.normal(ks[6], (512, C), jnp.float32) * 0.02
    bv = jax.random.normal(ks[7], (1, C), jnp.float32) * 0.02
    params = (w1, b1, wm, bm, wv, bv)

    fwd = jax.jit(adain_forward, static_argnames=("row_tile", "spatial_tile"))

    # Default (auto-chosen) tiles and an explicit multi-block (2x2 grid) tiling.
    out_auto = jax.block_until_ready(fwd(x, shared_code, alpha, params))
    out_tiled = jax.block_until_ready(
        fwd(x, shared_code, alpha, params, row_tile=8, spatial_tile=128))

    # Pure-JAX reference for correctness check.
    h = shared_code @ w1 + b1
    h = jnp.where(h > 0, h, 0.2 * h)
    mean_ref = h @ wm + bm
    var_ref = jnp.maximum(h @ wv + bv, 0.0)
    y = var_ref.reshape(N, C, 1, 1, 1) * x + mean_ref.reshape(N, C, 1, 1, 1)
    y = y * alpha + x * (1.0 - alpha)
    ref = jnp.where(y > 0, y, 0.2 * y)

    assert out_auto.shape == (N, C, D, H, W)
    assert jnp.allclose(out_auto, ref, atol=1e-5, rtol=1e-5), "auto-tile mismatch"
    assert jnp.allclose(out_tiled, ref, atol=1e-5, rtol=1e-5), "forced-tile mismatch"
    print("KERNEL_OK")
</pallas_src>

<mosaic_0001>
module attributes {stable_mosaic.version = 11 : i64} {
  func.func @_stats_kernel(%arg0: i32, %arg1: memref<1xf32, #tpu.memory_space<smem>>, %arg2: memref<2x512xf32, #tpu.memory_space<vmem>>, %arg3: memref<512x512xf32, #tpu.memory_space<vmem>>, %arg4: memref<1x512xf32, #tpu.memory_space<vmem>>, %arg5: memref<512x16xf32, #tpu.memory_space<vmem>>, %arg6: memref<1x16xf32, #tpu.memory_space<vmem>>, %arg7: memref<2x8xf32, #tpu.memory_space<vmem>>, %arg8: memref<2x8xf32, #tpu.memory_space<vmem>>) attributes {dimension_semantics = [#tpu.dimension_semantics<arbitrary>], iteration_bounds = array<i64: 1>, scalar_prefetch = 0 : i64, scratch_operands = 0 : i64, tpu.core_type = #tpu.core_type<tc>, window_params = [{transform_indices = @transform_0, window_bounds = array<i64: 1>}, {pipeline_mode = #tpu.pipeline_mode<synchronous>, transform_indices = @transform_1, window_bounds = array<i64: 2, 512>}, {pipeline_mode = #tpu.pipeline_mode<synchronous>, transform_indices = @transform_2, window_bounds = array<i64: 512, 512>}, {pipeline_mode = #tpu.pipeline_mode<synchronous>, transform_indices = @transform_3, window_bounds = array<i64: 1, 512>}, {pipeline_mode = #tpu.pipeline_mode<synchronous>, transform_indices = @transform_4, window_bounds = array<i64: 512, 16>}, {pipeline_mode = #tpu.pipeline_mode<synchronous>, transform_indices = @transform_5, window_bounds = array<i64: 1, 16>}, {pipeline_mode = #tpu.pipeline_mode<synchronous>, transform_indices = @transform_6, window_bounds = array<i64: 2, 8>}, {pipeline_mode = #tpu.pipeline_mode<synchronous>, transform_indices = @transform_7, window_bounds = array<i64: 2, 8>}]} {
    %c0 = arith.constant 0 : index
    %0 = memref.load %arg1[%c0] : memref<1xf32, #tpu.memory_space<smem>>
    %c0_0 = arith.constant 0 : index
    %c0_1 = arith.constant 0 : index
    %1 = vector.load %arg2[%c0_0, %c0_1] : memref<2x512xf32, #tpu.memory_space<vmem>>, vector<2x512xf32>
    %c0_2 = arith.constant 0 : index
    %c0_3 = arith.constant 0 : index
    %2 = vector.load %arg3[%c0_2, %c0_3] : memref<512x512xf32, #tpu.memory_space<vmem>>, vector<512x512xf32>
    %cst = arith.constant dense<0.000000e+00> : vector<2x512xf32>
    %3 = tpu.matmul %1, %2, %cst {dimension_numbers = #tpu.dot_dimension_numbers<[1], [0], [0], [1], [0, 0, 1, 1], [], []>} : vector<2x512xf32>, vector<512x512xf32>, vector<2x512xf32> -> vector<2x512xf32>
    %c0_4 = arith.constant 0 : index
    %c0_5 = arith.constant 0 : index
    %4 = vector.load %arg4[%c0_4, %c0_5] : memref<1x512xf32, #tpu.memory_space<vmem>>, vector<1x512xf32>
    %5 = vector.broadcast %4 : vector<1x512xf32> to vector<2x512xf32>
    %6 = arith.addf %3, %5 : vector<2x512xf32>
    %cst_6 = arith.constant 0.000000e+00 : f32
    %7 = vector.broadcast %cst_6 : f32 to vector<2x512xf32>
    %8 = arith.cmpf ogt, %6, %7 : vector<2x512xf32>
    %cst_7 = arith.constant 2.000000e-01 : f32
    %9 = vector.broadcast %cst_7 : f32 to vector<2x512xf32>
    %10 = arith.mulf %9, %6 : vector<2x512xf32>
    %11 = arith.select %8, %6, %10 : vector<2x512xi1>, vector<2x512xf32>
    %c0_8 = arith.constant 0 : index
    %c0_9 = arith.constant 0 : index
    %12 = vector.load %arg5[%c0_8, %c0_9] : memref<512x16xf32, #tpu.memory_space<vmem>>, vector<512x16xf32>
    %cst_10 = arith.constant dense<0.000000e+00> : vector<2x16xf32>
    %13 = tpu.matmul %11, %12, %cst_10 {dimension_numbers = #tpu.dot_dimension_numbers<[1], [0], [0], [1], [0, 0, 1, 1], [], []>} : vector<2x512xf32>, vector<512x16xf32>, vector<2x16xf32> -> vector<2x16xf32>
    %c0_11 = arith.constant 0 : index
    %c0_12 = arith.constant 0 : index
    %14 = vector.load %arg6[%c0_11, %c0_12] : memref<1x16xf32, #tpu.memory_space<vmem>>, vector<1x16xf32>
    %15 = vector.broadcast %14 : vector<1x16xf32> to vector<2x16xf32>
    %16 = arith.addf %13, %15 : vector<2x16xf32>
    %17 = vector.extract_strided_slice %16 {offsets = [0, 0], sizes = [2, 8], strides = [1, 1]} : vector<2x16xf32> to vector<2x8xf32>
    %18 = vector.extract_strided_slice %16 {offsets = [0, 8], sizes = [2, 8], strides = [1, 1]} : vector<2x16xf32> to vector<2x8xf32>
    %cst_13 = arith.constant 0.000000e+00 : f32
    %19 = vector.broadcast %cst_13 : f32 to vector<2x8xf32>
    %20 = arith.maximumf %18, %19 : vector<2x8xf32>
    %21 = vector.broadcast %0 : f32 to vector<2x8xf32>
    %22 = arith.mulf %21, %20 : vector<2x8xf32>
    %cst_14 = arith.constant 1.000000e+00 : f32
    %23 = arith.subf %cst_14, %0 : f32
    %24 = vector.broadcast %23 : f32 to vector<2x8xf32>
    %25 = arith.addf %22, %24 : vector<2x8xf32>
    %c0_15 = arith.constant 0 : index
    %c0_16 = arith.constant 0 : index
    %26 = vector.load %arg7[%c0_15, %c0_16] : memref<2x8xf32, #tpu.memory_space<vmem>>, vector<2x8xf32>
    tpu.vector_store %arg7[%c0_15, %c0_16], %25 {strides = array<i32>} : memref<2x8xf32, #tpu.memory_space<vmem>>, vector<2x8xf32>,
    %27 = vector.broadcast %0 : f32 to vector<2x8xf32>
    %28 = arith.mulf %27, %17 : vector<2x8xf32>
    %c0_17 = arith.constant 0 : index
    %c0_18 = arith.constant 0 : index
    %29 = vector.load %arg8[%c0_17, %c0_18] : memref<2x8xf32, #tpu.memory_space<vmem>>, vector<2x8xf32>
    tpu.vector_store %arg8[%c0_17, %c0_18], %28 {strides = array<i32>} : memref<2x8xf32, #tpu.memory_space<vmem>>, vector<2x8xf32>,
    return
  }
  func.func @transform_0(%arg0: i32) -> i32 {
    %c0_i32 = arith.constant 0 : i32
    %c0_i32_0 = arith.constant 0 : i32
    return %c0_i32 : i32
  }
  func.func @transform_1(%arg0: i32) -> (i32, i32) {
    %c0_i32 = arith.constant 0 : i32
    %c0_i32_0 = arith.constant 0 : i32
    %c0_i32_1 = arith.constant 0 : i32
    return %c0_i32, %c0_i32_0 : i32, i32
  }
  func.func @transform_2(%arg0: i32) -> (i32, i32) {
    %c0_i32 = arith.constant 0 : i32
    %c0_i32_0 = arith.constant 0 : i32
    %c0_i32_1 = arith.constant 0 : i32
    return %c0_i32, %c0_i32_0 : i32, i32
  }
  func.func @transform_3(%arg0: i32) -> (i32, i32) {
    %c0_i32 = arith.constant 0 : i32
    %c0_i32_0 = arith.constant 0 : i32
    %c0_i32_1 = arith.constant 0 : i32
    return %c0_i32, %c0_i32_0 : i32, i32
  }
  func.func @transform_4(%arg0: i32) -> (i32, i32) {
    %c0_i32 = arith.constant 0 : i32
    %c0_i32_0 = arith.constant 0 : i32
    %c0_i32_1 = arith.constant 0 : i32
    return %c0_i32, %c0_i32_0 : i32, i32
  }
  func.func @transform_5(%arg0: i32) -> (i32, i32) {
    %c0_i32 = arith.constant 0 : i32
    %c0_i32_0 = arith.constant 0 : i32
    %c0_i32_1 = arith.constant 0 : i32
    return %c0_i32, %c0_i32_0 : i32, i32
  }
  func.func @transform_6(%arg0: i32) -> (i32, i32) {
    %c0_i32 = arith.constant 0 : i32
    %c0_i32_0 = arith.constant 0 : i32
    %c0_i32_1 = arith.constant 0 : i32
    return %c0_i32, %c0_i32_0 : i32, i32
  }
  func.func @transform_7(%arg0: i32) -> (i32, i32) {
    %c0_i32 = arith.constant 0 : i32
    %c0_i32_0 = arith.constant 0 : i32
    %c0_i32_1 = arith.constant 0 : i32
    return %c0_i32, %c0_i32_0 : i32, i32
  }
}

module attributes {stable_mosaic.version = 11 : i64} {
  func.func @_modulate_kernel(%arg0: i32, %arg1: i32, %arg2: memref<16x256xf32, #tpu.memory_space<vmem>>, %arg3: memref<16x1xf32, #tpu.memory_space<vmem>>, %arg4: memref<16x1xf32, #tpu.memory_space<vmem>>, %arg5: memref<16x256xf32, #tpu.memory_space<vmem>>) attributes {dimension_semantics = [#tpu.dimension_semantics<parallel>, #tpu.dimension_semantics<parallel>], iteration_bounds = array<i64: 1, 1>, scalar_prefetch = 0 : i64, scratch_operands = 0 : i64, tpu.core_type = #tpu.core_type<tc>, window_params = [{transform_indices = @transform_0, window_bounds = array<i64: 16, 256>}, {transform_indices = @transform_1, window_bounds = array<i64: 16, 1>}, {transform_indices = @transform_2, window_bounds = array<i64: 16, 1>}, {transform_indices = @transform_3, window_bounds = array<i64: 16, 256>}]} {
    %c0 = arith.constant 0 : index
    %c0_0 = arith.constant 0 : index
    %0 = vector.load %arg3[%c0, %c0_0] : memref<16x1xf32, #tpu.memory_space<vmem>>, vector<16x1xf32>
    %c0_1 = arith.constant 0 : index
    %c0_2 = arith.constant 0 : index
    %1 = vector.load %arg2[%c0_1, %c0_2] : memref<16x256xf32, #tpu.memory_space<vmem>>, vector<16x256xf32>
    %2 = vector.broadcast %0 : vector<16x1xf32> to vector<16x256xf32>
    %3 = arith.mulf %2, %1 : vector<16x256xf32>
    %c0_3 = arith.constant 0 : index
    %c0_4 = arith.constant 0 : index
    %4 = vector.load %arg4[%c0_3, %c0_4] : memref<16x1xf32, #tpu.memory_space<vmem>>, vector<16x1xf32>
    %5 = vector.broadcast %4 : vector<16x1xf32> to vector<16x256xf32>
    %6 = arith.addf %3, %5 : vector<16x256xf32>
    %cst = arith.constant 0.000000e+00 : f32
    %7 = vector.broadcast %cst : f32 to vector<16x256xf32>
    %8 = arith.cmpf ogt, %6, %7 : vector<16x256xf32>
    %cst_5 = arith.constant 2.000000e-01 : f32
    %9 = vector.broadcast %cst_5 : f32 to vector<16x256xf32>
    %10 = arith.mulf %9, %6 : vector<16x256xf32>
    %11 = arith.select %8, %6, %10 : vector<16x256xi1>, vector<16x256xf32>
    %c0_6 = arith.constant 0 : index
    %c0_7 = arith.constant 0 : index
    %12 = vector.load %arg5[%c0_6, %c0_7] : memref<16x256xf32, #tpu.memory_space<vmem>>, vector<16x256xf32>
    tpu.vector_store %arg5[%c0_6, %c0_7], %11 {strides = array<i32>} : memref<16x256xf32, #tpu.memory_space<vmem>>, vector<16x256xf32>,
    return
  }
  func.func @transform_0(%arg0: i32, %arg1: i32) -> (i32, i32) {
    %c0_i32 = arith.constant 0 : i32
    return %arg0, %arg1 : i32, i32
  }
  func.func @transform_1(%arg0: i32, %arg1: i32) -> (i32, i32) {
    %c0_i32 = arith.constant 0 : i32
    %c0_i32_0 = arith.constant 0 : i32
    return %arg0, %c0_i32 : i32, i32
  }
  func.func @transform_2(%arg0: i32, %arg1: i32) -> (i32, i32) {
    %c0_i32 = arith.constant 0 : i32
    %c0_i32_0 = arith.constant 0 : i32
    return %arg0, %c0_i32 : i32, i32
  }
  func.func @transform_3(%arg0: i32, %arg1: i32) -> (i32, i32) {
    %c0_i32 = arith.constant 0 : i32
    return %arg0, %arg1 : i32, i32
  }
}

</mosaic_0001>

<bundles_post_ra>
// kernel: adain_forward.3
= control target key start
LH: loop header
LB: loop body
LE: loop exit
PB: predicated region body
PF: predicated region fallthrough
CT: control target
= control target key end

     0   :  { %v73_v0 = vmov 0   ;;  %s130_s2 = inlined_call_operand.vmem [shape: f32[16,1], index: 2, kind: input, shape index: {}]   ;;  %s131_s1 = inlined_call_operand.vmem [shape: f32[16,1], index: 1, kind: input, shape index: {}]   ;;  %s132_s0 = inlined_call_operand.vmem [shape: f32[16,256], index: 0, kind: input, shape index: {}]   ;;  %s133_s3 = inlined_call_operand.vmem [shape: f32[16,256], index: 3, kind: output, shape index: {}]  }
   0x1   :  { %72 = vset.pattern.permute.xlu1 %v73_v0  ;;  %71 = vset.pattern.permute.xlu0 %v73_v0  ;;  %v34_v1 = vld [vmem:[%s130_s2] sm:$0xff]  ;;  %v35_v3 = vld [vmem:[%s130_s2 + $0x8] sm:$0xff]  ;;  %v18_v15 = vld [vmem:[%s132_s0 + $0x10] sm:$0xff] }
   0x2   :  { %v14_v2 = vld [vmem:[%s131_s1] sm:$0xff]  ;;  %38 = vperm.xlu1 %72, %v34_v1   ;;  %v15_v4 = vld [vmem:[%s131_s1 + $0x8] sm:$0xff]  ;;  %v19_v16 = vld [vmem:[%s132_s0 + $0x18] sm:$0xff] }
   0x3   :  { %22 = vperm.xlu0 %71, %v14_v2   ;;  %v16_v5 = vld [vmem:[%s132_s0] sm:$0xff]  ;;  %v17_v6 = vld [vmem:[%s132_s0 + $0x8] sm:$0xff] }
   0xa   :  { %43 = vperm.xlu1 %72, %v35_v3  }
   0xb   :  { %27 = vperm.xlu0 %71, %v15_v4  }
  0x74   :  { %v39_v7 = vpop.permute.xlu1 %38 }
  0x75   :  { %v23_v8 = vpop.permute.xlu0 %22 }
  0x76   :  { %v30_v9 = vmul.f32 %v23_v8, %v16_v5  ;;  %v31_v10 = vmul.f32 %v23_v8, %v17_v6 }
  0x78   :  { %v46_v11 = vadd.f32 %v39_v7, %v30_v9  ;;  %v47_v12 = vadd.f32 %v39_v7, %v31_v10 }
  0x7a   :  { %vm50_vm0 = vcmp.gt.f32.partialorder %v46_v11, 0.0  ;;  %vm51_vm1 = vcmp.gt.f32.partialorder %v47_v12, 0.0  ;;  %v54_v13 = vmul.f32 0.2, %v46_v11  ;;  %v55_v14 = vmul.f32 0.2, %v47_v12 }
  0x7c   :  { %v58_v17 = vsel %vm50_vm0, %v46_v11, %v54_v13  ;;  %v59_v18 = vsel %vm51_vm1, %v47_v12, %v55_v14  ;;  %v44_v22 = vpop.permute.xlu1 %43 }
  0x7d   :  { %62 = vst [vmem:[%s133_s3] sm:$0xff] %v58_v17  ;;  %v28_v19 = vpop.permute.xlu0 %27 }
  0x7e   :  { %63 = vst [vmem:[%s133_s3 + $0x8] sm:$0xff] %v59_v18  ;;  %v32_v20 = vmul.f32 %v28_v19, %v18_v15  ;;  %v33_v21 = vmul.f32 %v28_v19, %v19_v16 }
  0x80   :  { %v48_v23 = vadd.f32 %v44_v22, %v32_v20  ;;  %v49_v24 = vadd.f32 %v44_v22, %v33_v21 }
  0x82   :  { %vm52_vm2 = vcmp.gt.f32.partialorder %v48_v23, 0.0  ;;  %vm53_vm3 = vcmp.gt.f32.partialorder %v49_v24, 0.0  ;;  %v56_v25 = vmul.f32 0.2, %v48_v23  ;;  %v57_v26 = vmul.f32 0.2, %v49_v24 }
  0x84   :  { %v60_v27 = vsel %vm52_vm2, %v48_v23, %v56_v25  ;;  %v61_v28 = vsel %vm53_vm3, %v49_v24, %v57_v26 }
  0x85   :  { %64 = vst [vmem:[%s133_s3 + $0x10] sm:$0xff] %v60_v27 }
  0x86   :  { %65 = vst [vmem:[%s133_s3 + $0x18] sm:$0xff] %v61_v28 }

// kernel: adain_forward.2
= control target key start
LH: loop header
LB: loop body
LE: loop exit
PB: predicated region body
PF: predicated region fallthrough
CT: control target
= control target key end

     0   :  { %14 = vsyncpa [#allocation4], 0  ;;  %s854_s27 = smov [#allocation3]   ;;  %s855_s29 = smov 512   ;;  %s1144_s0 = inlined_call_operand.<no memory space> [shape: f32[1], index: 0, kind: input, shape index: {}]   ;;  %s1145_s1 = inlined_call_operand.vmem [shape: f32[2,512], index: 1, kind: input, shape index: {}]   ;;  %s1146_s2 = inlined_call_operand.hbm [shape: f32[512,512], index: 2, kind: input, shape index: {}]   ;;  %s1147_s3 = inlined_call_operand.vmem [shape: f32[1,512], index: 3, kind: input, shape index: {}]   ;;  %s1148_s4 = inlined_call_operand.vmem [shape: f32[512,16], index: 4, kind: input, shape index: {}]   ;;  %s1149_s5 = inlined_call_operand.vmem [shape: f32[1,16], index: 5, kind: input, shape index: {}]   ;;  %s1150_s6 = inlined_call_operand.vmem [shape: f32[2,8], index: 6, kind: output, shape index: {0}]   ;;  %s1151_s7 = inlined_call_operand.vmem [shape: f32[2,8], index: 7, kind: output, shape index: {1}]  }
   0x1   :  { %s23_s26 = sshll.u32 %s1146_s2, 4  ;;  %s25_s28 = sshll.u32 %s854_s27, 4  ;;  %s24_s26 = int_to_ptr.hbm [resolvable:$true] %s23_s26  ;;  %s26_s28 = int_to_ptr.vmem [resolvable:$true] %s25_s28 }
   0x2   :  { %s856_s30 = smov 32  }
   0x3   :  { %31 = dma.hbm_to_vmem [thread:$0]  %s24_s26, 32768, %s26_s28, [#allocation4], %s855_s29, %s855_s29, %s856_s30  }
   0x4   :  { %852 = dma.done.wait [#allocation4], 32768  }
   0x5   :  { %853 = vsyncadd [#allocation4], 4294934528  ;;  %v232_v0 = vld [vmem:[#allocation3 + $0x5e0] sm:$0xff]  ;;  %v233_v62 = vld [vmem:[#allocation3 + $0x5e8] sm:$0xff]  ;;  %s803_s15 = ssub.f32 1.0, %s1144_s0  ;;  %vm810_vm4 = vcmask 58368  }
   0x6   :  { %v104_v1 = vld [vmem:[#allocation3 + $0x1e0] sm:$0xff]  ;;  %360 = vmatpush.msra.mxu2 %v232_v0  ;;  %v105_v0 = vld [vmem:[#allocation3 + $0x1e8] sm:$0xff]  ;;  %s857_s17 = smov 120  }
   0x7   :  { %v228_v2 = vld [vmem:[#allocation3 + $0x5c0] sm:$0xff]  ;;  %320 = vmatpush.msra.mxu0 %v104_v1  ;;  %v297_v1 = vld [vmem:[#allocation3 + $0x7e8] sm:$0xff] }
   0x8   :  { %v296_v3 = vld [vmem:[#allocation3 + $0x7e0] sm:$0xff]  ;;  %361 = vmatpush.msra.mxu2 %v228_v2  ;;  %v229_v2 = vld [vmem:[#allocation3 + $0x5c8] sm:$0xff] }
   0x9   :  { %v100_v4 = vld [vmem:[#allocation3 + $0x1c0] sm:$0xff]  ;;  %380 = vmatpush.msra.mxu3 %v296_v3 }
   0xa   :  { %v168_v5 = vld [vmem:[#allocation3 + $0x3e0] sm:$0xff]  ;;  %321 = vmatpush.msra.mxu0 %v100_v4  ;;  %v101_v4 = vld [vmem:[#allocation3 + $0x1c8] sm:$0xff] }
   0xb   :  { %340 = vmatpush.msra.mxu1 %v168_v5  ;;  %v224_v6 = vld [vmem:[#allocation3 + $0x5a0] sm:$0xff]  ;;  %v169_v5 = vld [vmem:[#allocation3 + $0x3e8] sm:$0xff] }
   0xc   :  { %v292_v7 = vld [vmem:[#allocation3 + $0x7c0] sm:$0xff]  ;;  %362 = vmatpush.msra.mxu2 %v224_v6  ;;  %v225_v6 = vld [vmem:[#allocation3 + $0x5a8] sm:$0xff] }
   0xd   :  { %v96_v8 = vld [vmem:[#allocation3 + $0x1a0] sm:$0xff]  ;;  %381 = vmatpush.msra.mxu3 %v292_v7  ;;  %v293_v7 = vld [vmem:[#allocation3 + $0x7c8] sm:$0xff] }
   0xe   :  { %v164_v9 = vld [vmem:[#allocation3 + $0x3c0] sm:$0xff]  ;;  %322 = vmatpush.msra.mxu0 %v96_v8  ;;  %v97_v8 = vld [vmem:[#allocation3 + $0x1a8] sm:$0xff] }
   0xf   :  { %v288_v10 = vld [vmem:[#allocation3 + $0x7a0] sm:$0xff]  ;;  %341 = vmatpush.msra.mxu1 %v164_v9  ;;  %v165_v9 = vld [vmem:[#allocation3 + $0x3c8] sm:$0xff] }
  0x10   :  { %v220_v11 = vld [vmem:[#allocation3 + $0x580] sm:$0xff]  ;;  %382 = vmatpush.msra.mxu3 %v288_v10  ;;  %v221_v10 = vld [vmem:[#allocation3 + $0x588] sm:$0xff] }
  0x11   :  { %v92_v12 = vld [vmem:[#allocation3 + $0x180] sm:$0xff]  ;;  %363 = vmatpush.msra.mxu2 %v220_v11  ;;  %v289_v11 = vld [vmem:[#allocation3 + $0x7a8] sm:$0xff] }
  0x12   :  { %v160_v13 = vld [vmem:[#allocation3 + $0x3a0] sm:$0xff]  ;;  %323 = vmatpush.msra.mxu0 %v92_v12  ;;  %v93_v12 = vld [vmem:[#allocation3 + $0x188] sm:$0xff] }
  0x13   :  { %v284_v14 = vld [vmem:[#allocation3 + $0x780] sm:$0xff]  ;;  %342 = vmatpush.msra.mxu1 %v160_v13  ;;  %v161_v13 = vld [vmem:[#allocation3 + $0x3a8] sm:$0xff] }
  0x14   :  { %v156_v15 = vld [vmem:[#allocation3 + $0x380] sm:$0xff]  ;;  %383 = vmatpush.msra.mxu3 %v284_v14  ;;  %v43_v14 = vld [vmem:[%s1145_s1] sm:$0xff] }
  0x15   :  { %v216_v16 = vld [vmem:[#allocation3 + $0x560] sm:$0xff]  ;;  %343 = vmatpush.msra.mxu1 %v156_v15  ;;  %v217_v15 = vld [vmem:[#allocation3 + $0x568] sm:$0xff]  ;;  %311 = vst [vmem:[#allocation1] ss:$4 sm:$0xff] %v43_v14  ;;  %v222_v14 = vld [vmem:[#allocation3 + $0x590] sm:$0xff] }
  0x16   :  { %v88_v17 = vld [vmem:[#allocation3 + $0x160] sm:$0xff]  ;;  %364 = vmatpush.msra.mxu2 %v216_v16  ;;  %v285_v16 = vld [vmem:[#allocation3 + $0x788] sm:$0xff] }
  0x17   :  { %v280_v18 = vld [vmem:[#allocation3 + $0x760] sm:$0xff]  ;;  %324 = vmatpush.msra.mxu0 %v88_v17  ;;  %v89_v17 = vld [vmem:[#allocation3 + $0x168] sm:$0xff] }
  0x18   :  { %v152_v19 = vld [vmem:[#allocation3 + $0x360] sm:$0xff]  ;;  %384 = vmatpush.msra.mxu3 %v280_v18  ;;  %v157_v18 = vld [vmem:[#allocation3 + $0x388] sm:$0xff] }
  0x19   :  { %v212_v20 = vld [vmem:[#allocation3 + $0x540] sm:$0xff]  ;;  %344 = vmatpush.msra.mxu1 %v152_v19  ;;  %v213_v19 = vld [vmem:[#allocation3 + $0x548] sm:$0xff] }
  0x1a   :  { %v84_v21 = vld [vmem:[#allocation3 + $0x140] sm:$0xff]  ;;  %365 = vmatpush.msra.mxu2 %v212_v20  ;;  %v281_v20 = vld [vmem:[#allocation3 + $0x768] sm:$0xff] }
  0x1b   :  { %v276_v22 = vld [vmem:[#allocation3 + $0x740] sm:$0xff]  ;;  %325 = vmatpush.msra.mxu0 %v84_v21  ;;  %v85_v21 = vld [vmem:[#allocation3 + $0x148] sm:$0xff] }
  0x1c   :  { %v148_v23 = vld [vmem:[#allocation3 + $0x340] sm:$0xff]  ;;  %385 = vmatpush.msra.mxu3 %v276_v22  ;;  %v153_v22 = vld [vmem:[#allocation3 + $0x368] sm:$0xff] }
  0x1d   :  { %v208_v24 = vld [vmem:[#allocation3 + $0x520] sm:$0xff]  ;;  %345 = vmatpush.msra.mxu1 %v148_v23  ;;  %v209_v23 = vld [vmem:[#allocation3 + $0x528] sm:$0xff] }
  0x1e   :  { %v80_v25 = vld [vmem:[#allocation3 + $0x120] sm:$0xff]  ;;  %366 = vmatpush.msra.mxu2 %v208_v24  ;;  %v277_v24 = vld [vmem:[#allocation3 + $0x748] sm:$0xff] }
  0x1f   :  { %v272_v26 = vld [vmem:[#allocation3 + $0x720] sm:$0xff]  ;;  %326 = vmatpush.msra.mxu0 %v80_v25  ;;  %v81_v25 = vld [vmem:[#allocation3 + $0x128] sm:$0xff] }
  0x20   :  { %v144_v27 = vld [vmem:[#allocation3 + $0x320] sm:$0xff]  ;;  %386 = vmatpush.msra.mxu3 %v272_v26  ;;  %v149_v26 = vld [vmem:[#allocation3 + $0x348] sm:$0xff] }
  0x21   :  { %v204_v28 = vld [vmem:[#allocation3 + $0x500] sm:$0xff]  ;;  %346 = vmatpush.msra.mxu1 %v144_v27  ;;  %v205_v27 = vld [vmem:[#allocation3 + $0x508] sm:$0xff] }
  0x22   :  { %v76_v29 = vld [vmem:[#allocation3 + $0x100] sm:$0xff]  ;;  %367 = vmatpush.msra.mxu2 %v204_v28  ;;  %v273_v28 = vld [vmem:[#allocation3 + $0x728] sm:$0xff] }
  0x23   :  { %v268_v30 = vld [vmem:[#allocation3 + $0x700] sm:$0xff]  ;;  %327 = vmatpush.msra.mxu0 %v76_v29  ;;  %v77_v29 = vld [vmem:[#allocation3 + $0x108] sm:$0xff] }
  0x24   :  { %v140_v31 = vld [vmem:[#allocation3 + $0x300] sm:$0xff]  ;;  %387 = vmatpush.msra.mxu3 %v268_v30  ;;  %v145_v30 = vld [vmem:[#allocation3 + $0x328] sm:$0xff] }
  0x25   :  { %v200_v32 = vld [vmem:[#allocation3 + $0x4e0] sm:$0xff]  ;;  %347 = vmatpush.msra.mxu1 %v140_v31  ;;  %v201_v31 = vld [vmem:[#allocation3 + $0x4e8] sm:$0xff] }
  0x26   :  { %v72_v33 = vld [vmem:[#allocation3 + $0xe0] sm:$0xff]  ;;  %368 = vmatpush.msra.mxu2 %v200_v32  ;;  %v269_v32 = vld [vmem:[#allocation3 + $0x708] sm:$0xff] }
  0x27   :  { %v264_v34 = vld [vmem:[#allocation3 + $0x6e0] sm:$0xff]  ;;  %328 = vmatpush.msra.mxu0 %v72_v33  ;;  %v73_v33 = vld [vmem:[#allocation3 + $0xe8] sm:$0xff] }
  0x28   :  { %v136_v35 = vld [vmem:[#allocation3 + $0x2e0] sm:$0xff]  ;;  %388 = vmatpush.msra.mxu3 %v264_v34  ;;  %v141_v34 = vld [vmem:[#allocation3 + $0x308] sm:$0xff] }
  0x29   :  { %v196_v36 = vld [vmem:[#allocation3 + $0x4c0] sm:$0xff]  ;;  %348 = vmatpush.msra.mxu1 %v136_v35  ;;  %v197_v35 = vld [vmem:[#allocation3 + $0x4c8] sm:$0xff] }
  0x2a   :  { %v68_v37 = vld [vmem:[#allocation3 + $0xc0] sm:$0xff]  ;;  %369 = vmatpush.msra.mxu2 %v196_v36  ;;  %v265_v36 = vld [vmem:[#allocation3 + $0x6e8] sm:$0xff] }
  0x2b   :  { %v260_v38 = vld [vmem:[#allocation3 + $0x6c0] sm:$0xff]  ;;  %329 = vmatpush.msra.mxu0 %v68_v37  ;;  %v69_v37 = vld [vmem:[#allocation3 + $0xc8] sm:$0xff] }
  0x2c   :  { %v132_v39 = vld [vmem:[#allocation3 + $0x2c0] sm:$0xff]  ;;  %389 = vmatpush.msra.mxu3 %v260_v38  ;;  %v137_v38 = vld [vmem:[#allocation3 + $0x2e8] sm:$0xff] }
  0x2d   :  { %v192_v40 = vld [vmem:[#allocation3 + $0x4a0] sm:$0xff]  ;;  %349 = vmatpush.msra.mxu1 %v132_v39  ;;  %v193_v39 = vld [vmem:[#allocation3 + $0x4a8] sm:$0xff] }
  0x2e   :  { %v64_v41 = vld [vmem:[#allocation3 + $0xa0] sm:$0xff]  ;;  %370 = vmatpush.msra.mxu2 %v192_v40  ;;  %v261_v40 = vld [vmem:[#allocation3 + $0x6c8] sm:$0xff] }
  0x2f   :  { %v256_v42 = vld [vmem:[#allocation3 + $0x6a0] sm:$0xff]  ;;  %330 = vmatpush.msra.mxu0 %v64_v41  ;;  %v65_v41 = vld [vmem:[#allocation3 + $0xa8] sm:$0xff] }
  0x30   :  { %v128_v43 = vld [vmem:[#allocation3 + $0x2a0] sm:$0xff]  ;;  %390 = vmatpush.msra.mxu3 %v256_v42  ;;  %v133_v42 = vld [vmem:[#allocation3 + $0x2c8] sm:$0xff] }
  0x31   :  { %v188_v44 = vld [vmem:[#allocation3 + $0x480] sm:$0xff]  ;;  %350 = vmatpush.msra.mxu1 %v128_v43  ;;  %v189_v43 = vld [vmem:[#allocation3 + $0x488] sm:$0xff] }
  0x32   :  { %v60_v45 = vld [vmem:[#allocation3 + $0x80] sm:$0xff]  ;;  %371 = vmatpush.msra.mxu2 %v188_v44  ;;  %v257_v44 = vld [vmem:[#allocation3 + $0x6a8] sm:$0xff] }
  0x33   :  { %v252_v46 = vld [vmem:[#allocation3 + $0x680] sm:$0xff]  ;;  %331 = vmatpush.msra.mxu0 %v60_v45  ;;  %v904_v45 = vld.sshfl [vmem:[#allocation1 + $0x10] sm:$0xff pattern:$0x73625140] }
  0x34   :  { %v124_v47 = vld [vmem:[#allocation3 + $0x280] sm:$0xff]  ;;  %391 = vmatpush.msra.mxu3 %v252_v46  ;;  %v61_v46 = vld [vmem:[#allocation3 + $0x88] sm:$0xff] }
  0x35   :  { %v184_v48 = vld [vmem:[#allocation3 + $0x460] sm:$0xff]  ;;  %351 = vmatpush.msra.mxu1 %v124_v47  ;;  %v129_v47 = vld [vmem:[#allocation3 + $0x2a8] sm:$0xff] }
  0x36   :  { %v56_v49 = vld [vmem:[#allocation3 + $0x60] sm:$0xff]  ;;  %372 = vmatpush.msra.mxu2 %v184_v48  ;;  %v185_v48 = vld [vmem:[#allocation3 + $0x468] sm:$0xff] }
  0x37   :  { %v248_v50 = vld [vmem:[#allocation3 + $0x660] sm:$0xff]  ;;  %332 = vmatpush.msra.mxu0 %v56_v49  ;;  %v253_v49 = vld [vmem:[#allocation3 + $0x688] sm:$0xff] }
  0x38   :  { %v120_v51 = vld [vmem:[#allocation3 + $0x260] sm:$0xff]  ;;  %392 = vmatpush.msra.mxu3 %v248_v50  ;;  %v906_v50 = vld.sshfl [vmem:[#allocation1] sm:$0xff pattern:$0x73625140] }
  0x39   :  { %v180_v52 = vld [vmem:[#allocation3 + $0x440] sm:$0xff]  ;;  %352 = vmatpush.msra.mxu1 %v120_v51  ;;  %v909_v51 = vld.sshfl [vmem:[#allocation1 + $0x18] sm:$0xff pattern:$0x73625140] }
  0x3a   :  { %v52_v53 = vld [vmem:[#allocation3 + $0x40] sm:$0xff]  ;;  %373 = vmatpush.msra.mxu2 %v180_v52  ;;  %v57_v52 = vld [vmem:[#allocation3 + $0x68] sm:$0xff] }
  0x3b   :  { %v244_v54 = vld [vmem:[#allocation3 + $0x640] sm:$0xff]  ;;  %333 = vmatpush.msra.mxu0 %v52_v53  ;;  %v125_v53 = vld [vmem:[#allocation3 + $0x288] sm:$0xff] }
  0x3c   :  { %v116_v55 = vld [vmem:[#allocation3 + $0x240] sm:$0xff]  ;;  %393 = vmatpush.msra.mxu3 %v244_v54  ;;  %v181_v54 = vld [vmem:[#allocation3 + $0x448] sm:$0xff] }
  0x3d   :  { %v176_v56 = vld [vmem:[#allocation3 + $0x420] sm:$0xff]  ;;  %353 = vmatpush.msra.mxu1 %v116_v55  ;;  %v249_v55 = vld [vmem:[#allocation3 + $0x668] sm:$0xff] }
  0x3e   :  { %v48_v57 = vld [vmem:[#allocation3 + $0x20] sm:$0xff]  ;;  %374 = vmatpush.msra.mxu2 %v176_v56 }
  0x3f   :  { %v240_v58 = vld [vmem:[#allocation3 + $0x620] sm:$0xff]  ;;  %334 = vmatpush.msra.mxu0 %v48_v57  ;;  %v53_v57 = vld [vmem:[#allocation3 + $0x48] sm:$0xff] }
  0x40   :  { %v112_v59 = vld [vmem:[#allocation3 + $0x220] sm:$0xff]  ;;  %394 = vmatpush.msra.mxu3 %v240_v58  ;;  %v121_v58 = vld [vmem:[#allocation3 + $0x268] sm:$0xff] }
  0x41   :  { %v172_v60 = vld [vmem:[#allocation3 + $0x400] sm:$0xff]  ;;  %354 = vmatpush.msra.mxu1 %v112_v59  ;;  %v177_v59 = vld [vmem:[#allocation3 + $0x428] sm:$0xff] }
  0x42   :  { %v44_v61 = vld [vmem:[#allocation3] sm:$0xff]  ;;  %375 = vmatpush.msra.mxu2 %v172_v60  ;;  %v245_v60 = vld [vmem:[#allocation3 + $0x648] sm:$0xff] }
  0x43   :  { %v236_v63 = vld [vmem:[#allocation3 + $0x600] sm:$0xff]  ;;  %335 = vmatpush.msra.mxu0 %v44_v61  ;;  %376 = vmatmul.f32.vlgmr.msra.gmra.mxu2 %v904_v45  ;;  %v49_v61 = vld [vmem:[#allocation3 + $0x28] sm:$0xff] }
  0x44   :  { %v108_v3 = vld [vmem:[#allocation3 + $0x200] sm:$0xff]  ;;  %440 = vmatpush.msrb.mxu2 %v233_v62  ;;  %395 = vmatpush.msra.mxu3 %v236_v63  ;;  %v117_v62 = vld [vmem:[#allocation3 + $0x248] sm:$0xff] }
  0x45   :  { %400 = vmatpush.msrb.mxu0 %v105_v0  ;;  %355 = vmatpush.msra.mxu1 %v108_v3  ;;  %v912_v56 = vld.sshfl [vmem:[#allocation1 + $0x8] sm:$0xff pattern:$0x73625140]  ;;  %v173_v63 = vld [vmem:[#allocation3 + $0x408] sm:$0xff] }
  0x46   :  { %460 = vmatpush.msrb.mxu3 %v297_v1  ;;  %441 = vmatpush.msrb.mxu2 %v229_v2  ;;  %v241_v0 = vld [vmem:[#allocation3 + $0x628] sm:$0xff]  ;;  %v234_v2 = vld [vmem:[#allocation3 + $0x5f0] sm:$0xff] }
  0x47   :  { %401 = vmatpush.msrb.mxu0 %v101_v4  ;;  %420 = vmatpush.msrb.mxu1 %v169_v5  ;;  %v45_v1 = vld [vmem:[#allocation3 + $0x8] sm:$0xff]  ;;  %v106_v5 = vld [vmem:[#allocation3 + $0x1f0] sm:$0xff] }
  0x48   :  { %442 = vmatpush.msrb.mxu2 %v225_v6  ;;  %461 = vmatpush.msrb.mxu3 %v293_v7  ;;  %v113_v3 = vld [vmem:[#allocation3 + $0x228] sm:$0xff]  ;;  %v230_v6 = vld [vmem:[#allocation3 + $0x5d0] sm:$0xff] }
  0x49   :  { %402 = vmatpush.msrb.mxu0 %v97_v8  ;;  %421 = vmatpush.msrb.mxu1 %v165_v9  ;;  %v237_v4 = vld [vmem:[#allocation3 + $0x608] sm:$0xff]  ;;  %v298_v7 = vld [vmem:[#allocation3 + $0x7f0] sm:$0xff] }
  0x4a   :  { %443 = vmatpush.msrb.mxu2 %v221_v10  ;;  %462 = vmatpush.msrb.mxu3 %v289_v11  ;;  %v109_v8 = vld [vmem:[#allocation3 + $0x208] sm:$0xff]  ;;  %v102_v9 = vld [vmem:[#allocation3 + $0x1d0] sm:$0xff] }
  0x4b   :  { %403 = vmatpush.msrb.mxu0 %v93_v12  ;;  %422 = vmatpush.msrb.mxu1 %v161_v13  ;;  %v226_v10 = vld [vmem:[#allocation3 + $0x5b0] sm:$0xff] }
  0x4c   :  { %444 = vmatpush.msrb.mxu2 %v217_v15  ;;  %463 = vmatpush.msrb.mxu3 %v285_v16  ;;  %v170_v11 = vld [vmem:[#allocation3 + $0x3f0] sm:$0xff] }
  0x4d   :  { %404 = vmatpush.msrb.mxu0 %v89_v17  ;;  %423 = vmatpush.msrb.mxu1 %v157_v18  ;;  %v294_v12 = vld [vmem:[#allocation3 + $0x7d0] sm:$0xff] }
  0x4e   :  { %445 = vmatpush.msrb.mxu2 %v213_v19  ;;  %464 = vmatpush.msrb.mxu3 %v281_v20  ;;  %v98_v13 = vld [vmem:[#allocation3 + $0x1b0] sm:$0xff] }
  0x4f   :  { %405 = vmatpush.msrb.mxu0 %v85_v21  ;;  %424 = vmatpush.msrb.mxu1 %v153_v22  ;;  %v166_v15 = vld [vmem:[#allocation3 + $0x3d0] sm:$0xff] }
  0x50   :  { %446 = vmatpush.msrb.mxu2 %v209_v23  ;;  %465 = vmatpush.msrb.mxu3 %v277_v24  ;;  %v290_v16 = vld [vmem:[#allocation3 + $0x7b0] sm:$0xff] }
  0x51   :  { %406 = vmatpush.msrb.mxu0 %v81_v25  ;;  %425 = vmatpush.msrb.mxu1 %v149_v26  ;;  %v94_v17 = vld [vmem:[#allocation3 + $0x190] sm:$0xff] }
  0x52   :  { %447 = vmatpush.msrb.mxu2 %v205_v27  ;;  %466 = vmatpush.msrb.mxu3 %v273_v28  ;;  %v218_v18 = vld [vmem:[#allocation3 + $0x570] sm:$0xff] }
  0x53   :  { %407 = vmatpush.msrb.mxu0 %v77_v29  ;;  %426 = vmatpush.msrb.mxu1 %v145_v30  ;;  %v162_v19 = vld [vmem:[#allocation3 + $0x3b0] sm:$0xff] }
  0x54   :  { %448 = vmatpush.msrb.mxu2 %v201_v31  ;;  %467 = vmatpush.msrb.mxu3 %v269_v32  ;;  %v286_v20 = vld [vmem:[#allocation3 + $0x790] sm:$0xff] }
  0x55   :  { %408 = vmatpush.msrb.mxu0 %v73_v33  ;;  %427 = vmatpush.msrb.mxu1 %v141_v34  ;;  %v90_v21 = vld [vmem:[#allocation3 + $0x170] sm:$0xff] }
  0x56   :  { %449 = vmatpush.msrb.mxu2 %v197_v35  ;;  %468 = vmatpush.msrb.mxu3 %v265_v36  ;;  %v214_v22 = vld [vmem:[#allocation3 + $0x550] sm:$0xff] }
  0x57   :  { %409 = vmatpush.msrb.mxu0 %v69_v37  ;;  %428 = vmatpush.msrb.mxu1 %v137_v38  ;;  %v158_v23 = vld [vmem:[#allocation3 + $0x390] sm:$0xff] }
  0x58   :  { %450 = vmatpush.msrb.mxu2 %v193_v39  ;;  %469 = vmatpush.msrb.mxu3 %v261_v40  ;;  %v282_v24 = vld [vmem:[#allocation3 + $0x770] sm:$0xff] }
  0x59   :  { %410 = vmatpush.msrb.mxu0 %v65_v41  ;;  %429 = vmatpush.msrb.mxu1 %v133_v42  ;;  %v86_v25 = vld [vmem:[#allocation3 + $0x150] sm:$0xff] }
  0x5a   :  { %451 = vmatpush.msrb.mxu2 %v189_v43  ;;  %470 = vmatpush.msrb.mxu3 %v257_v44  ;;  %v210_v26 = vld [vmem:[#allocation3 + $0x530] sm:$0xff] }
  0x5b   :  { %411 = vmatpush.msrb.mxu0 %v61_v46  ;;  %430 = vmatpush.msrb.mxu1 %v129_v47  ;;  %v154_v27 = vld [vmem:[#allocation3 + $0x370] sm:$0xff] }
  0x5c   :  { %452 = vmatpush.msrb.mxu2 %v185_v48  ;;  %471 = vmatpush.msrb.mxu3 %v253_v49  ;;  %v278_v28 = vld [vmem:[#allocation3 + $0x750] sm:$0xff] }
  0x5d   :  { %336 = vmatmul.f32.vlgmr.msra.gmra.mxu0 %v906_v50  ;;  %396 = vmatmul.f32.vlgmr.msra.gmra.mxu3 %v909_v51  ;;  %v82_v29 = vld [vmem:[#allocation3 + $0x130] sm:$0xff] }
  0x5e   :  { %412 = vmatpush.msrb.mxu0 %v57_v52  ;;  %431 = vmatpush.msrb.mxu1 %v125_v53  ;;  %v206_v30 = vld [vmem:[#allocation3 + $0x510] sm:$0xff] }
  0x5f   :  { %453 = vmatpush.msrb.mxu2 %v181_v54  ;;  %472 = vmatpush.msrb.mxu3 %v249_v55  ;;  %v150_v31 = vld [vmem:[#allocation3 + $0x350] sm:$0xff] }
  0x60   :  { %356 = vmatmul.f32.vlgmr.msra.gmra.mxu1 %v912_v56  ;;  %413 = vmatpush.msrb.mxu0 %v53_v57  ;;  %v274_v32 = vld [vmem:[#allocation3 + $0x730] sm:$0xff] }
  0x61   :  { %432 = vmatpush.msrb.mxu1 %v121_v58  ;;  %454 = vmatpush.msrb.mxu2 %v177_v59  ;;  %v78_v33 = vld [vmem:[#allocation3 + $0x110] sm:$0xff] }
  0x62   :  { %473 = vmatpush.msrb.mxu3 %v245_v60  ;;  %414 = vmatpush.msrb.mxu0 %v49_v61  ;;  %v202_v34 = vld [vmem:[#allocation3 + $0x4f0] sm:$0xff] }
  0x63   :  { %433 = vmatpush.msrb.mxu1 %v117_v62  ;;  %455 = vmatpush.msrb.mxu2 %v173_v63  ;;  %v146_v35 = vld [vmem:[#allocation3 + $0x330] sm:$0xff] }
  0x64   :  { %474 = vmatpush.msrb.mxu3 %v241_v0  ;;  %456 = vmatmul.f32.vlgmr.msrb.gmra.mxu2 %v904_v45  ;;  %v270_v36 = vld [vmem:[#allocation3 + $0x710] sm:$0xff] }
  0x65   :  { %415 = vmatpush.msrb.mxu0 %v45_v1  ;;  %520 = vmatpush.msra.mxu2 %v234_v2  ;;  %v74_v37 = vld [vmem:[#allocation3 + $0xf0] sm:$0xff] }
  0x66   :  { %434 = vmatpush.msrb.mxu1 %v113_v3  ;;  %475 = vmatpush.msrb.mxu3 %v237_v4  ;;  %v198_v38 = vld [vmem:[#allocation3 + $0x4d0] sm:$0xff] }
  0x67   :  { %416 = vmatmul.f32.vlgmr.msrb.gmra.mxu0 %v906_v50  ;;  %476 = vmatmul.f32.vlgmr.msrb.gmra.mxu3 %v909_v51  ;;  %v142_v39 = vld [vmem:[#allocation3 + $0x310] sm:$0xff] }
  0x68   :  { %480 = vmatpush.msra.mxu0 %v106_v5  ;;  %521 = vmatpush.msra.mxu2 %v230_v6  ;;  %v266_v40 = vld [vmem:[#allocation3 + $0x6f0] sm:$0xff]  ;;  %v235_v6 = vld [vmem:[#allocation3 + $0x5f8] sm:$0xff] }
  0x69   :  { %540 = vmatpush.msra.mxu3 %v298_v7  ;;  %435 = vmatpush.msrb.mxu1 %v109_v8  ;;  %v70_v41 = vld [vmem:[#allocation3 + $0xd0] sm:$0xff] }
  0x6a   :  { %481 = vmatpush.msra.mxu0 %v102_v9  ;;  %436 = vmatmul.f32.vlgmr.msrb.gmra.mxu1 %v912_v56  ;;  %v194_v42 = vld [vmem:[#allocation3 + $0x4b0] sm:$0xff]  ;;  %v107_v9 = vld [vmem:[#allocation3 + $0x1f8] sm:$0xff] }
  0x6b   :  { %522 = vmatpush.msra.mxu2 %v226_v10  ;;  %500 = vmatpush.msra.mxu1 %v170_v11  ;;  %v138_v43 = vld [vmem:[#allocation3 + $0x2f0] sm:$0xff]  ;;  %v231_v10 = vld [vmem:[#allocation3 + $0x5d8] sm:$0xff] }
  0x6c   :  { %541 = vmatpush.msra.mxu3 %v294_v12  ;;  %482 = vmatpush.msra.mxu0 %v98_v13  ;;  %v262_v44 = vld [vmem:[#allocation3 + $0x6d0] sm:$0xff]  ;;  %v299_v11 = vld [vmem:[#allocation3 + $0x7f8] sm:$0xff] }
  0x6d   :  { %523 = vmatpush.msra.mxu2 %v222_v14  ;;  %501 = vmatpush.msra.mxu1 %v166_v15  ;;  %v66_v46 = vld [vmem:[#allocation3 + $0xb0] sm:$0xff]  ;;  %v103_v13 = vld [vmem:[#allocation3 + $0x1d8] sm:$0xff] }
  0x6e   :  { %542 = vmatpush.msra.mxu3 %v290_v16  ;;  %483 = vmatpush.msra.mxu0 %v94_v17  ;;  %v190_v47 = vld [vmem:[#allocation3 + $0x490] sm:$0xff]  ;;  %v227_v14 = vld [vmem:[#allocation3 + $0x5b8] sm:$0xff] }
  0x6f   :  { %524 = vmatpush.msra.mxu2 %v218_v18  ;;  %502 = vmatpush.msra.mxu1 %v162_v19  ;;  %v134_v48 = vld [vmem:[#allocation3 + $0x2d0] sm:$0xff]  ;;  %v171_v15 = vld [vmem:[#allocation3 + $0x3f8] sm:$0xff] }
  0x70   :  { %543 = vmatpush.msra.mxu3 %v286_v20  ;;  %484 = vmatpush.msra.mxu0 %v90_v21  ;;  %v258_v49 = vld [vmem:[#allocation3 + $0x6b0] sm:$0xff]  ;;  %v295_v16 = vld [vmem:[#allocation3 + $0x7d8] sm:$0xff] }
  0x71   :  { %525 = vmatpush.msra.mxu2 %v214_v22  ;;  %503 = vmatpush.msra.mxu1 %v158_v23  ;;  %v62_v52 = vld [vmem:[#allocation3 + $0x90] sm:$0xff]  ;;  %v99_v17 = vld [vmem:[#allocation3 + $0x1b8] sm:$0xff] }
  0x72   :  { %544 = vmatpush.msra.mxu3 %v282_v24  ;;  %485 = vmatpush.msra.mxu0 %v86_v25  ;;  %v186_v53 = vld [vmem:[#allocation3 + $0x470] sm:$0xff]  ;;  %v223_v18 = vld [vmem:[#allocation3 + $0x598] sm:$0xff] }
  0x73   :  { %526 = vmatpush.msra.mxu2 %v210_v26  ;;  %504 = vmatpush.msra.mxu1 %v154_v27  ;;  %v130_v54 = vld [vmem:[#allocation3 + $0x2b0] sm:$0xff]  ;;  %v167_v19 = vld [vmem:[#allocation3 + $0x3d8] sm:$0xff] }
  0x74   :  { %545 = vmatpush.msra.mxu3 %v278_v28  ;;  %486 = vmatpush.msra.mxu0 %v82_v29  ;;  %v254_v55 = vld [vmem:[#allocation3 + $0x690] sm:$0xff]  ;;  %v291_v20 = vld [vmem:[#allocation3 + $0x7b8] sm:$0xff] }
  0x75   :  { %527 = vmatpush.msra.mxu2 %v206_v30  ;;  %505 = vmatpush.msra.mxu1 %v150_v31  ;;  %v58_v57 = vld [vmem:[#allocation3 + $0x70] sm:$0xff]  ;;  %v95_v21 = vld [vmem:[#allocation3 + $0x198] sm:$0xff] }
  0x76   :  { %546 = vmatpush.msra.mxu3 %v274_v32  ;;  %487 = vmatpush.msra.mxu0 %v78_v33  ;;  %v182_v58 = vld [vmem:[#allocation3 + $0x450] sm:$0xff]  ;;  %v219_v22 = vld [vmem:[#allocation3 + $0x578] sm:$0xff] }
  0x77   :  { %528 = vmatpush.msra.mxu2 %v202_v34  ;;  %506 = vmatpush.msra.mxu1 %v146_v35  ;;  %v126_v59 = vld [vmem:[#allocation3 + $0x290] sm:$0xff]  ;;  %v163_v23 = vld [vmem:[#allocation3 + $0x3b8] sm:$0xff] }
  0x78   :  { %547 = vmatpush.msra.mxu3 %v270_v36  ;;  %488 = vmatpush.msra.mxu0 %v74_v37  ;;  %v250_v60 = vld [vmem:[#allocation3 + $0x670] sm:$0xff]  ;;  %v287_v24 = vld [vmem:[#allocation3 + $0x798] sm:$0xff] }
  0x79   :  { %529 = vmatpush.msra.mxu2 %v198_v38  ;;  %507 = vmatpush.msra.mxu1 %v142_v39  ;;  %v54_v61 = vld [vmem:[#allocation3 + $0x50] sm:$0xff]  ;;  %v91_v25 = vld [vmem:[#allocation3 + $0x178] sm:$0xff] }
  0x7a   :  { %548 = vmatpush.msra.mxu3 %v266_v40  ;;  %489 = vmatpush.msra.mxu0 %v70_v41  ;;  %v178_v62 = vld [vmem:[#allocation3 + $0x430] sm:$0xff]  ;;  %v215_v26 = vld [vmem:[#allocation3 + $0x558] sm:$0xff] }
  0x7b   :  { %530 = vmatpush.msra.mxu2 %v194_v42  ;;  %508 = vmatpush.msra.mxu1 %v138_v43  ;;  %v122_v63 = vld [vmem:[#allocation3 + $0x270] sm:$0xff]  ;;  %v159_v27 = vld [vmem:[#allocation3 + $0x398] sm:$0xff] }
  0x7c   :  { %549 = vmatpush.msra.mxu3 %v262_v44  ;;  %490 = vmatpush.msra.mxu0 %v66_v46  ;;  %v246_v0 = vld [vmem:[#allocation3 + $0x650] sm:$0xff]  ;;  %v283_v28 = vld [vmem:[#allocation3 + $0x778] sm:$0xff] }
  0x7d   :  { %531 = vmatpush.msra.mxu2 %v190_v47  ;;  %509 = vmatpush.msra.mxu1 %v134_v48  ;;  %v50_v1 = vld [vmem:[#allocation3 + $0x30] sm:$0xff]  ;;  %v87_v29 = vld [vmem:[#allocation3 + $0x158] sm:$0xff] }
  0x7e   :  { %550 = vmatpush.msra.mxu3 %v258_v49  ;;  %491 = vmatpush.msra.mxu0 %v62_v52  ;;  %v174_v2 = vld [vmem:[#allocation3 + $0x410] sm:$0xff]  ;;  %v211_v30 = vld [vmem:[#allocation3 + $0x538] sm:$0xff] }
  0x7f   :  { %532 = vmatpush.msra.mxu2 %v186_v53  ;;  %510 = vmatpush.msra.mxu1 %v130_v54  ;;  %v118_v3 = vld [vmem:[#allocation3 + $0x250] sm:$0xff]  ;;  %v155_v31 = vld [vmem:[#allocation3 + $0x378] sm:$0xff] }
  0x80   :  { %551 = vmatpush.msra.mxu3 %v254_v55  ;;  %492 = vmatpush.msra.mxu0 %v58_v57  ;;  %v242_v4 = vld [vmem:[#allocation3 + $0x630] sm:$0xff]  ;;  %v279_v32 = vld [vmem:[#allocation3 + $0x758] sm:$0xff] }
  0x81   :  { %533 = vmatpush.msra.mxu2 %v182_v58  ;;  %511 = vmatpush.msra.mxu1 %v126_v59  ;;  %v46_v5 = vld [vmem:[#allocation3 + $0x10] sm:$0xff]  ;;  %v83_v33 = vld [vmem:[#allocation3 + $0x138] sm:$0xff] }
  0x82   :  { %552 = vmatpush.msra.mxu3 %v250_v60  ;;  %493 = vmatpush.msra.mxu0 %v54_v61  ;;  %v114_v7 = vld [vmem:[#allocation3 + $0x230] sm:$0xff]  ;;  %v207_v34 = vld [vmem:[#allocation3 + $0x518] sm:$0xff] }
  0x83   :  { %534 = vmatpush.msra.mxu2 %v178_v62  ;;  %512 = vmatpush.msra.mxu1 %v122_v63  ;;  %v238_v8 = vld [vmem:[#allocation3 + $0x610] sm:$0xff]  ;;  %v151_v35 = vld [vmem:[#allocation3 + $0x358] sm:$0xff] }
  0x84   :  { %553 = vmatpush.msra.mxu3 %v246_v0  ;;  %494 = vmatpush.msra.mxu0 %v50_v1  ;;  %v110_v12 = vld [vmem:[#allocation3 + $0x210] sm:$0xff]  ;;  %v275_v36 = vld [vmem:[#allocation3 + $0x738] sm:$0xff] }
  0x85   :  { %535 = vmatpush.msra.mxu2 %v174_v2  ;;  %513 = vmatpush.msra.mxu1 %v118_v3  ;;  %v79_v37 = vld [vmem:[#allocation3 + $0x118] sm:$0xff] }
  0x86   :  { %554 = vmatpush.msra.mxu3 %v242_v4  ;;  %536 = vmatmul.f32.vlgmr.msra.gmra.mxu2 %v904_v45  ;;  %v203_v38 = vld [vmem:[#allocation3 + $0x4f8] sm:$0xff] }
  0x87   :  { %495 = vmatpush.msra.mxu0 %v46_v5  ;;  %600 = vmatpush.msrb.mxu2 %v235_v6  ;;  %v147_v39 = vld [vmem:[#allocation3 + $0x338] sm:$0xff] }
  0x88   :  { %514 = vmatpush.msra.mxu1 %v114_v7  ;;  %555 = vmatpush.msra.mxu3 %v238_v8  ;;  %v271_v40 = vld [vmem:[#allocation3 + $0x718] sm:$0xff] }
  0x89   :  { %496 = vmatmul.f32.vlgmr.msra.gmra.mxu0 %v906_v50  ;;  %556 = vmatmul.f32.vlgmr.msra.gmra.mxu3 %v909_v51  ;;  %v75_v41 = vld [vmem:[#allocation3 + $0xf8] sm:$0xff] }
  0x8a   :  { %560 = vmatpush.msrb.mxu0 %v107_v9  ;;  %601 = vmatpush.msrb.mxu2 %v231_v10  ;;  %v199_v42 = vld [vmem:[#allocation3 + $0x4d8] sm:$0xff] }
  0x8b   :  { %620 = vmatpush.msrb.mxu3 %v299_v11  ;;  %515 = vmatpush.msra.mxu1 %v110_v12  ;;  %v143_v43 = vld [vmem:[#allocation3 + $0x318] sm:$0xff] }
  0x8c   :  { %561 = vmatpush.msrb.mxu0 %v103_v13  ;;  %516 = vmatmul.f32.vlgmr.msra.gmra.mxu1 %v912_v56  ;;  %v267_v44 = vld [vmem:[#allocation3 + $0x6f8] sm:$0xff]  ;;  %v667_v13 = vld [vmem:[%s1148_s4 + $0x78] sm:$0xff] }
  0x8d   :  { %602 = vmatpush.msrb.mxu2 %v227_v14  ;;  %580 = vmatpush.msrb.mxu1 %v171_v15  ;;  %v71_v46 = vld [vmem:[#allocation3 + $0xd8] sm:$0xff]  ;;  %v666_v14 = vld [vmem:[%s1148_s4 + $0x70] sm:$0xff]  ;;  %v665_v15 = vld [vmem:[%s1148_s4 + $0x68] sm:$0xff] }
  0x8e   :  { %621 = vmatpush.msrb.mxu3 %v295_v16  ;;  %562 = vmatpush.msrb.mxu0 %v99_v17  ;;  %v195_v47 = vld [vmem:[#allocation3 + $0x4b8] sm:$0xff]  ;;  %v681_v16 = vld [vmem:[%s1148_s4 + $0xe8] sm:$0xff] }
  0x8f   :  { %603 = vmatpush.msrb.mxu2 %v223_v18  ;;  %581 = vmatpush.msrb.mxu1 %v167_v19  ;;  %v139_v48 = vld [vmem:[#allocation3 + $0x2f8] sm:$0xff]  ;;  %v662_v18 = vld [vmem:[%s1148_s4 + $0x50] sm:$0xff]  ;;  %v679_v19 = vld [vmem:[%s1148_s4 + $0xd8] sm:$0xff] }
  0x90   :  { %622 = vmatpush.msrb.mxu3 %v291_v20  ;;  %563 = vmatpush.msrb.mxu0 %v95_v21  ;;  %v263_v49 = vld [vmem:[#allocation3 + $0x6d8] sm:$0xff]  ;;  %v661_v20 = vld [vmem:[%s1148_s4 + $0x48] sm:$0xff]  ;;  %v678_v21 = vld [vmem:[%s1148_s4 + $0xd0] sm:$0xff] }
  0x91   :  { %604 = vmatpush.msrb.mxu2 %v219_v22  ;;  %582 = vmatpush.msrb.mxu1 %v163_v23  ;;  %v67_v52 = vld [vmem:[#allocation3 + $0xb8] sm:$0xff]  ;;  %v677_v23 = vld [vmem:[%s1148_s4 + $0xc8] sm:$0xff] }
  0x92   :  { %623 = vmatpush.msrb.mxu3 %v287_v24  ;;  %564 = vmatpush.msrb.mxu0 %v91_v25  ;;  %v191_v53 = vld [vmem:[#allocation3 + $0x498] sm:$0xff]  ;;  %v659_v24 = vld [vmem:[%s1148_s4 + $0x38] sm:$0xff] }
  0x93   :  { %605 = vmatpush.msrb.mxu2 %v215_v26  ;;  %583 = vmatpush.msrb.mxu1 %v159_v27  ;;  %v135_v54 = vld [vmem:[#allocation3 + $0x2d8] sm:$0xff]  ;;  %v658_v26 = vld [vmem:[%s1148_s4 + $0x30] sm:$0xff]  ;;  %v675_v27 = vld [vmem:[%s1148_s4 + $0xb8] sm:$0xff] }
  0x94   :  { %624 = vmatpush.msrb.mxu3 %v283_v28  ;;  %565 = vmatpush.msrb.mxu0 %v87_v29  ;;  %v259_v55 = vld [vmem:[#allocation3 + $0x6b8] sm:$0xff]  ;;  %v657_v28 = vld [vmem:[%s1148_s4 + $0x28] sm:$0xff]  ;;  %v674_v29 = vld [vmem:[%s1148_s4 + $0xb0] sm:$0xff] }
  0x95   :  { %606 = vmatpush.msrb.mxu2 %v211_v30  ;;  %584 = vmatpush.msrb.mxu1 %v155_v31  ;;  %v63_v57 = vld [vmem:[#allocation3 + $0x98] sm:$0xff]  ;;  %v673_v31 = vld [vmem:[%s1148_s4 + $0xa8] sm:$0xff] }
  0x96   :  { %625 = vmatpush.msrb.mxu3 %v279_v32  ;;  %566 = vmatpush.msrb.mxu0 %v83_v33  ;;  %v187_v58 = vld [vmem:[#allocation3 + $0x478] sm:$0xff]  ;;  %v655_v32 = vld [vmem:[%s1148_s4 + $0x18] sm:$0xff] }
  0x97   :  { %607 = vmatpush.msrb.mxu2 %v207_v34  ;;  %585 = vmatpush.msrb.mxu1 %v151_v35  ;;  %v131_v59 = vld [vmem:[#allocation3 + $0x2b8] sm:$0xff]  ;;  %v654_v34 = vld [vmem:[%s1148_s4 + $0x10] sm:$0xff]  ;;  %v671_v35 = vld [vmem:[%s1148_s4 + $0x98] sm:$0xff] }
  0x98   :  { %626 = vmatpush.msrb.mxu3 %v275_v36  ;;  %567 = vmatpush.msrb.mxu0 %v79_v37  ;;  %v255_v60 = vld [vmem:[#allocation3 + $0x698] sm:$0xff]  ;;  %v653_v36 = vld [vmem:[%s1148_s4 + $0x8] sm:$0xff]  ;;  %v670_v37 = vld [vmem:[%s1148_s4 + $0x90] sm:$0xff] }
  0x99   :  { %608 = vmatpush.msrb.mxu2 %v203_v38  ;;  %586 = vmatpush.msrb.mxu1 %v147_v39  ;;  %v59_v61 = vld [vmem:[#allocation3 + $0x78] sm:$0xff]  ;;  %v669_v39 = vld [vmem:[%s1148_s4 + $0x88] sm:$0xff] }
  0x9a   :  { %627 = vmatpush.msrb.mxu3 %v271_v40  ;;  %568 = vmatpush.msrb.mxu0 %v75_v41  ;;  %v183_v62 = vld [vmem:[#allocation3 + $0x458] sm:$0xff]  ;;  %v699_v41 = vld [vmem:[%s1148_s4 + $0x178] sm:$0xff] }
  0x9b   :  { %609 = vmatpush.msrb.mxu2 %v199_v42  ;;  %587 = vmatpush.msrb.mxu1 %v143_v43  ;;  %v127_v63 = vld [vmem:[#allocation3 + $0x298] sm:$0xff]  ;;  %v698_v42 = vld [vmem:[%s1148_s4 + $0x170] sm:$0xff] }
  0x9c   :  { %628 = vmatpush.msrb.mxu3 %v267_v44  ;;  %569 = vmatpush.msrb.mxu0 %v71_v46  ;;  %v251_v0 = vld [vmem:[#allocation3 + $0x678] sm:$0xff]  ;;  %v697_v44 = vld [vmem:[%s1148_s4 + $0x168] sm:$0xff] }
  0x9d   :  { %610 = vmatpush.msrb.mxu2 %v195_v47  ;;  %588 = vmatpush.msrb.mxu1 %v139_v48  ;;  %v55_v1 = vld [vmem:[#allocation3 + $0x58] sm:$0xff]  ;;  %v695_v48 = vld [vmem:[%s1148_s4 + $0x158] sm:$0xff] }
  0x9e   :  { %629 = vmatpush.msrb.mxu3 %v263_v49  ;;  %570 = vmatpush.msrb.mxu0 %v67_v52  ;;  %v179_v2 = vld [vmem:[#allocation3 + $0x438] sm:$0xff]  ;;  %v694_v52 = vld [vmem:[%s1148_s4 + $0x150] sm:$0xff] }
  0x9f   :  { %611 = vmatpush.msrb.mxu2 %v191_v53  ;;  %589 = vmatpush.msrb.mxu1 %v135_v54  ;;  %v123_v3 = vld [vmem:[#allocation3 + $0x278] sm:$0xff]  ;;  %v693_v54 = vld [vmem:[%s1148_s4 + $0x148] sm:$0xff] }
  0xa0   :  { %630 = vmatpush.msrb.mxu3 %v259_v55  ;;  %571 = vmatpush.msrb.mxu0 %v63_v57  ;;  %v247_v4 = vld [vmem:[#allocation3 + $0x658] sm:$0xff] }
  0xa1   :  { %612 = vmatpush.msrb.mxu2 %v187_v58  ;;  %590 = vmatpush.msrb.mxu1 %v131_v59  ;;  %v51_v5 = vld [vmem:[#allocation3 + $0x38] sm:$0xff] }
  0xa2   :  { %631 = vmatpush.msrb.mxu3 %v255_v60  ;;  %572 = vmatpush.msrb.mxu0 %v59_v61  ;;  %v175_v6 = vld [vmem:[#allocation3 + $0x418] sm:$0xff]  ;;  %v691_v61 = vld [vmem:[%s1148_s4 + $0x138] sm:$0xff] }
  0xa3   :  { %613 = vmatpush.msrb.mxu2 %v183_v62  ;;  %591 = vmatpush.msrb.mxu1 %v127_v63  ;;  %v119_v7 = vld [vmem:[#allocation3 + $0x258] sm:$0xff] }
  0xa4   :  { %632 = vmatpush.msrb.mxu3 %v251_v0  ;;  %573 = vmatpush.msrb.mxu0 %v55_v1  ;;  %v243_v8 = vld [vmem:[#allocation3 + $0x638] sm:$0xff]  ;;  %v690_v1 = vld [vmem:[%s1148_s4 + $0x130] sm:$0xff] }
  0xa5   :  { %614 = vmatpush.msrb.mxu2 %v179_v2  ;;  %592 = vmatpush.msrb.mxu1 %v123_v3  ;;  %v47_v9 = vld [vmem:[#allocation3 + $0x18] sm:$0xff] }
  0xa6   :  { %633 = vmatpush.msrb.mxu3 %v247_v4  ;;  %574 = vmatpush.msrb.mxu0 %v51_v5  ;;  %v115_v10 = vld [vmem:[#allocation3 + $0x238] sm:$0xff] }
  0xa7   :  { %615 = vmatpush.msrb.mxu2 %v175_v6  ;;  %v239_v11 = vld [vmem:[#allocation3 + $0x618] sm:$0xff]  ;;  %593 = vmatpush.msrb.mxu1 %v119_v7  ;;  %v689_v6 = vld [vmem:[%s1148_s4 + $0x128] sm:$0xff] }
  0xa8   :  { %634 = vmatpush.msrb.mxu3 %v243_v8  ;;  %616 = vmatmul.f32.vlgmr.msrb.gmra.mxu2 %v904_v45  ;;  %v111_v12 = vld [vmem:[#allocation3 + $0x218] sm:$0xff]  ;;  %v683_v45 = vld [vmem:[%s1148_s4 + $0xf8] sm:$0xff] }
  0xa9   :  { %575 = vmatpush.msrb.mxu0 %v47_v9  ;;  %594 = vmatpush.msrb.mxu1 %v115_v10  ;;  %v680_v17 = vld [vmem:[%s1148_s4 + $0xe0] sm:$0xff] }
  0xaa   :  { %635 = vmatpush.msrb.mxu3 %v239_v11  ;;  %576 = vmatmul.f32.vlgmr.msrb.gmra.mxu0 %v906_v50  ;;  %v682_v50 = vld [vmem:[%s1148_s4 + $0xf0] sm:$0xff]  ;;  %v660_v22 = vld [vmem:[%s1148_s4 + $0x40] sm:$0xff] }
  0xab   :  { %636 = vmatmul.f32.vlgmr.msrb.gmra.mxu3 %v909_v51  ;;  %595 = vmatpush.msrb.mxu1 %v111_v12  ;;  %v664_v51 = vld [vmem:[%s1148_s4 + $0x60] sm:$0xff] }
  0xac   :  { %720 = vmatpush.msra.mxu0 %v667_v13  ;;  %596 = vmatmul.f32.vlgmr.msrb.gmra.mxu1 %v912_v56  ;;  %v663_v56 = vld [vmem:[%s1148_s4 + $0x58] sm:$0xff]  ;;  %v676_v25 = vld [vmem:[%s1148_s4 + $0xc0] sm:$0xff] }
  0xad   :  { %740 = vmatpush.msra.mxu1 %v683_v45  ;;  %v656_v30 = vld [vmem:[%s1148_s4 + $0x20] sm:$0xff]  ;;  %760 = vmatpush.msra.mxu2 %v699_v41 }
  0xae   :  { %721 = vmatpush.msra.mxu0 %v666_v14  ;;  %v672_v33 = vld [vmem:[%s1148_s4 + $0xa0] sm:$0xff]  ;;  %v687_v14 = vld [vmem:[%s1148_s4 + $0x118] sm:$0xff] }
  0xaf   :  { %741 = vmatpush.msra.mxu1 %v682_v50  ;;  %v652_v38 = vld [vmem:[%s1148_s4] sm:$0xff]  ;;  %761 = vmatpush.msra.mxu2 %v698_v42 }
  0xb0   :  { %722 = vmatpush.msra.mxu0 %v665_v15  ;;  %v668_v40 = vld [vmem:[%s1148_s4 + $0x80] sm:$0xff]  ;;  %v686_v15 = vld [vmem:[%s1148_s4 + $0x110] sm:$0xff] }
  0xb1   :  { %742 = vmatpush.msra.mxu1 %v681_v16  ;;  %v1033_v43 = vld [vmem:[%s1147_s3] sm:$0xf]  ;;  %762 = vmatpush.msra.mxu2 %v697_v44 }
  0xb2   :  { %723 = vmatpush.msra.mxu0 %v664_v51  ;;  %v696_v46 = vld [vmem:[%s1148_s4 + $0x160] sm:$0xff]  ;;  %v302_v47 = vperm.slane %v1033_v43, 0  ;;  %v303_v63 = vperm.slane %v1033_v43, 1  ;;  %v685_v51 = vld [vmem:[%s1148_s4 + $0x108] sm:$0xff]  ;;  %v305_v44 = vperm.slane %v1033_v43, 3 }
  0xb3   :  { %743 = vmatpush.msra.mxu1 %v680_v17  ;;  %763 = vmatpush.msra.mxu2 %v696_v46  ;;  %v692_v59 = vld [vmem:[%s1148_s4 + $0x140] sm:$0xff]  ;;  %v714_v17 = vld [vmem:[%s1148_s4 + $0x1f0] sm:$0xff] }
  0xb4   :  { %724 = vmatpush.msra.mxu0 %v663_v56  ;;  %v688_v12 = vld [vmem:[%s1148_s4 + $0x120] sm:$0xff]  ;;  %v715_v56 = vld [vmem:[%s1148_s4 + $0x1f8] sm:$0xff] }
  0xb5   :  { %744 = vmatpush.msra.mxu1 %v679_v19  ;;  %764 = vmatpush.msra.mxu2 %v695_v48  ;;  %v684_v16 = vld [vmem:[%s1148_s4 + $0x100] sm:$0xff] }
  0xb6   :  { %725 = vmatpush.msra.mxu0 %v662_v18  ;;  %780 = vmatpush.msra.mxu3 %v715_v56  ;;  %v713_v18 = vld [vmem:[%s1148_s4 + $0x1e8] sm:$0xff]  ;;  %v712_v19 = vld [vmem:[%s1148_s4 + $0x1e0] sm:$0xff] }
  0xb7   :  { %745 = vmatpush.msra.mxu1 %v678_v21  ;;  %765 = vmatpush.msra.mxu2 %v694_v52  ;;  %v710_v21 = vld [vmem:[%s1148_s4 + $0x1d0] sm:$0xff]  ;;  %v700_v41 = vld [vmem:[%s1148_s4 + $0x180] sm:$0xff] }
  0xb8   :  { %726 = vmatpush.msra.mxu0 %v661_v20  ;;  %781 = vmatpush.msra.mxu3 %v714_v17  ;;  %v711_v20 = vld [vmem:[%s1148_s4 + $0x1d8] sm:$0xff] }
  0xb9   :  { %746 = vmatpush.msra.mxu1 %v677_v23  ;;  %766 = vmatpush.msra.mxu2 %v693_v54  ;;  %v708_v23 = vld [vmem:[%s1148_s4 + $0x1c0] sm:$0xff] }
  0xba   :  { %727 = vmatpush.msra.mxu0 %v660_v22  ;;  %782 = vmatpush.msra.mxu3 %v713_v18  ;;  %v709_v22 = vld [vmem:[%s1148_s4 + $0x1c8] sm:$0xff] }
  0xbb   :  { %747 = vmatpush.msra.mxu1 %v676_v25  ;;  %767 = vmatpush.msra.mxu2 %v692_v59  ;;  %v304_v25 = vperm.slane %v1033_v43, 2  ;;  %v827_v59 = vld [vmem:[%s1149_s5] ss:$0 sm:$0xff] }
  0xbc   :  { %728 = vmatpush.msra.mxu0 %v659_v24  ;;  %783 = vmatpush.msra.mxu3 %v712_v19  ;;  %v707_v24 = vld [vmem:[%s1148_s4 + $0x1b8] sm:$0xff] }
  0xbd   :  { %748 = vmatpush.msra.mxu1 %v675_v27  ;;  %768 = vmatpush.msra.mxu2 %v691_v61 }
  0xbe   :  { %729 = vmatpush.msra.mxu0 %v658_v26  ;;  %784 = vmatpush.msra.mxu3 %v711_v20  ;;  %v706_v26 = vld [vmem:[%s1148_s4 + $0x1b0] sm:$0xff] }
  0xbf   :  { %749 = vmatpush.msra.mxu1 %v674_v29  ;;  %769 = vmatpush.msra.mxu2 %v690_v1  ;;  %v705_v29 = vld [vmem:[%s1148_s4 + $0x1a8] sm:$0xff] }
  0xc0   :  { %730 = vmatpush.msra.mxu0 %v657_v28  ;;  %785 = vmatpush.msra.mxu3 %v710_v21 }
  0xc1   :  { %750 = vmatpush.msra.mxu1 %v673_v31  ;;  %770 = vmatpush.msra.mxu2 %v689_v6  ;;  %v804_v6 = vstv %s803_s15 }
  0xc2   :  { %731 = vmatpush.msra.mxu0 %v656_v30  ;;  %786 = vmatpush.msra.mxu3 %v709_v22 }
  0xc3   :  { %751 = vmatpush.msra.mxu1 %v672_v33  ;;  %771 = vmatpush.msra.mxu2 %v688_v12 }
  0xc4   :  { %732 = vmatpush.msra.mxu0 %v655_v32  ;;  %787 = vmatpush.msra.mxu3 %v708_v23  ;;  %v704_v32 = vld [vmem:[%s1148_s4 + $0x1a0] sm:$0xff] }
  0xc5   :  { %752 = vmatpush.msra.mxu1 %v671_v35  ;;  %772 = vmatpush.msra.mxu2 %v687_v14 }
  0xc6   :  { %733 = vmatpush.msra.mxu0 %v654_v34  ;;  %v377_v58 = vpop.f32.mrf.mxu2  ;;  %788 = vmatpush.msra.mxu3 %v707_v24  ;;  %v703_v34 = vld [vmem:[%s1148_s4 + $0x198] sm:$0xff] }
  0xc7   :  { %753 = vmatpush.msra.mxu1 %v670_v37  ;;  %773 = vmatpush.msra.mxu2 %v686_v15  ;;  %v702_v37 = vld [vmem:[%s1148_s4 + $0x190] sm:$0xff] }
  0xc8   :  { %734 = vmatpush.msra.mxu0 %v653_v36  ;;  %789 = vmatpush.msra.mxu3 %v706_v26 }
  0xc9   :  { %754 = vmatpush.msra.mxu1 %v669_v39  ;;  %774 = vmatpush.msra.mxu2 %v685_v51  ;;  %v701_v39 = vld [vmem:[%s1148_s4 + $0x188] sm:$0xff] }
  0xca   :  { %735 = vmatpush.msra.mxu0 %v652_v38  ;;  %790 = vmatpush.msra.mxu3 %v705_v29 }
  0xcb   :  { %755 = vmatpush.msra.mxu1 %v668_v40  ;;  %775 = vmatpush.msra.mxu2 %v684_v16 }
  0xcc   :  { %791 = vmatpush.msra.mxu3 %v704_v32 }
  0xce   :  { %792 = vmatpush.msra.mxu3 %v703_v34 }
  0xd0   :  { %793 = vmatpush.msra.mxu3 %v702_v37 }
  0xd2   :  { %794 = vmatpush.msra.mxu3 %v701_v39 }
  0xd4   :  { %795 = vmatpush.msra.mxu3 %v700_v41 }
  0xda   :  { %v337_v49 = vpop.f32.mrf.mxu0 }
  0xdb   :  { %v338_v53 = vadd.f32 %v337_v49, %v302_v47 }
  0xdd   :  { %v357_v55 = vpop.f32.mrf.mxu1 }
  0xde   :  { %v358_v57 = vadd.f32 %v357_v55, %v338_v53 }
  0xe0   :  { %v378_v60 = vadd.f32 %v377_v58, %v358_v57  ;;  %v397_v62 = vpop.f32.mrf.mxu3 }
  0xe2   :  { %v398_v0 = vadd.f32 %v397_v62, %v378_v60 }
  0xe4   :  { %vm640_vm0 = vcmp.gt.f32.partialorder %v398_v0, 0.0  ;;  %v644_v2 = vmul.f32 0.2, %v398_v0  ;;  %v417_v3 = vpop.f32.mrf.mxu0 }
  0xe5   :  { %v418_v4 = vadd.f32 %v417_v3, %v303_v63 }
  0xe6   :  { %v648_v5 = vsel %vm640_vm0, %v398_v0, %v644_v2  ;;  %v801_v2 = vstv %s1144_s0 }
  0xe7   :  { %736 = vmatmul.f32.vlgmr.msra.gmra.mxu0 %v648_v5  ;;  %v437_v7 = vpop.f32.mrf.mxu1  ;;  %v457_v8 = vpop.f32.mrf.mxu2 }
  0xe8   :  { %v438_v9 = vadd.f32 %v437_v7, %v418_v4 }
  0xea   :  { %v458_v10 = vadd.f32 %v457_v8, %v438_v9  ;;  %v477_v11 = vpop.f32.mrf.mxu3 }
  0xec   :  { %v478_v13 = vadd.f32 %v477_v11, %v458_v10 }
  0xee   :  { %vm641_vm1 = vcmp.gt.f32.partialorder %v478_v13, 0.0  ;;  %v645_v45 = vmul.f32 0.2, %v478_v13 }
  0xf0   :  { %v649_v50 = vsel %vm641_vm1, %v478_v13, %v645_v45 }
  0xf1   :  { %756 = vmatmul.f32.vlgmr.msra.gmra.mxu1 %v649_v50 }
 0x106   :  { %v497_v27 = vpop.f32.mrf.mxu0 }
 0x107   :  { %v498_v28 = vadd.f32 %v497_v27, %v304_v25 }
 0x109   :  { %v517_v30 = vpop.f32.mrf.mxu1  ;;  %v537_v31 = vpop.f32.mrf.mxu2 }
 0x10a   :  { %v518_v33 = vadd.f32 %v517_v30, %v498_v28 }
 0x10c   :  { %v538_v35 = vadd.f32 %v537_v31, %v518_v33  ;;  %v557_v36 = vpop.f32.mrf.mxu3 }
 0x10e   :  { %v558_v38 = vadd.f32 %v557_v36, %v538_v35 }
 0x110   :  { %vm642_vm2 = vcmp.gt.f32.partialorder %v558_v38, 0.0  ;;  %v646_v40 = vmul.f32 0.2, %v558_v38 }
 0x112   :  { %v650_v42 = vsel %vm642_vm2, %v558_v38, %v646_v40 }
 0x113   :  { %776 = vmatmul.f32.vlgmr.msra.gmra.mxu2 %v650_v42 }
 0x127   :  { %v577_v46 = vpop.f32.mrf.mxu0 }
 0x128   :  { %v578_v47 = vadd.f32 %v577_v46, %v305_v44 }
 0x129   :  { %v597_v48 = vpop.f32.mrf.mxu1 }
 0x12a   :  { %v598_v49 = vadd.f32 %v597_v48, %v578_v47 }
 0x12b   :  { %v617_v52 = vpop.f32.mrf.mxu2 }
 0x12c   :  { %v618_v53 = vadd.f32 %v617_v52, %v598_v49 }
 0x12e   :  { %v637_v54 = vpop.f32.mrf.mxu3 }
 0x12f   :  { %v638_v55 = vadd.f32 %v637_v54, %v618_v53 }
 0x131   :  { %vm643_vm3 = vcmp.gt.f32.partialorder %v638_v55, 0.0  ;;  %v647_v57 = vmul.f32 0.2, %v638_v55 }
 0x133   :  { %v651_v58 = vsel %vm643_vm3, %v638_v55, %v647_v57 }
 0x134   :  { %796 = vmatmul.f32.vlgmr.msra.gmra.mxu3 %v651_v58 }
 0x164   :  { %v737_v60 = vpop.f32.mrf.mxu0 }
 0x165   :  { %v738_v61 = vadd.f32 %v827_v59, %v737_v60 }
 0x16e   :  { %v757_v62 = vpop.f32.mrf.mxu1 }
 0x16f   :  { %v758_v63 = vadd.f32 %v757_v62, %v738_v61 }
 0x196   :  { %v777_v43 = vpop.f32.mrf.mxu2 }
 0x197   :  { %v778_v0 = vadd.f32 %v777_v43, %v758_v63 }
 0x1b7   :  { %v797_v1 = vpop.f32.mrf.mxu3 }
 0x1b8   :  { %v798_v3 = vadd.f32 %v797_v1, %v778_v0 }
 0x1ba   :  { %v800_v4 = vmax.f32 %v798_v3, 0.0  ;;  %v812_v5 = vmul.f32 %v801_v2, %v798_v3 }
 0x1bc   :  { %v802_v7 = vmul.f32 %v801_v2, %v800_v4  ;;  %813 = vst.msk [vmem:[%s1151_s7] sm:$0x3] %vm810_vm4, %v812_v5 }
 0x1be   :  { %v805_v8 = vadd.f32 %v804_v6, %v802_v7 }
 0x1c0   :  { %807 = vrot.lane.b32.xlu0 %v805_v8, %s857_s17 }
 0x232   :  { %v808_v9 = vpop.permute.xlu0 %807 }
 0x233   :  { %811 = vst.msk [vmem:[%s1150_s6] sm:$0x3] %vm810_vm4, %v808_v9 }
 0x234   :  { %822 = vsyncpa [#allocation4], 1 }

</bundles_post_ra>
